<compile_context>
chip_gen: v7x
topology: tpu7x:2x2x1
jax: 0.10.0
libtpu: 0.0.40
codegen_flags: <defaults>
</compile_context>

<pallas_src>
import functools

import jax
import jax.numpy as jnp
from jax.experimental import pallas as pl
from jax.experimental.pallas import tpu as pltpu


def _round_up(x, m):
    return ((x + m - 1) // m) * m


def _multi_margin_kernel(pred_ref, label_ref, out_ref, acc_ref, *,
                         n_total, inv_nc, need_mask):
    p = pl.program_id(0)                 # parallel slice (megacore)
    t = pl.program_id(1)                 # reduction step within the slice
    tiles_per_slice = pl.num_programs(1)

    @pl.when(t == 0)
    def _():
        acc_ref[...] = jnp.zeros_like(acc_ref)

    pred = pred_ref[...].astype(jnp.float32)          # (TILE_N, C) f32 math (v5e-safe)
    labels = label_ref[...]                           # (TILE_N, 1) i32
    tn, c = pred.shape

    class_ids = jax.lax.broadcasted_iota(jnp.int32, (tn, c), dimension=1)
    onehot = class_ids == labels                      # (TILE_N, C) bool

    # x[y_i] per row
    x_y = jnp.sum(jnp.where(onehot, pred, 0.0), axis=1, keepdims=True)   # (TILE_N, 1)

    # hinge over all classes; diagonal (j == y_i) explicitly zeroed (exact vs. reference)
    hinge = jnp.maximum(0.0, 1.0 - x_y + pred)                           # (TILE_N, C)
    hinge = jnp.where(onehot, 0.0, hinge)
    row_sum = jnp.sum(hinge, axis=1, keepdims=True)                      # (TILE_N, 1)

    if need_mask:
        # mask rows past the true batch size (remainder / padded duplicate tiles)
        tile = p * tiles_per_slice + t
        row_ids = tile * tn + jax.lax.broadcasted_iota(jnp.int32, (tn, 1), dimension=0)
        row_sum = jnp.where(row_ids < n_total, row_sum, 0.0)

    acc_ref[...] += row_sum

    @pl.when(t == tiles_per_slice - 1)
    def _():
        total = jnp.sum(acc_ref[...], axis=0, keepdims=True)             # (1, 1)
        out_ref[...] = jnp.broadcast_to(total * jnp.float32(inv_nc), out_ref.shape)


def _choose_tile_n(n, c, itemsize, requested=None, vmem_budget=24 << 20):
    """VMEM-, dtype- and C-aware batch-tile selection."""
    # sublane alignment matching dtype packing (8 rows/vreg f32, 16 bf16, 32 int8/fp8)
    align = {4: 8, 2: 16, 1: 32}.get(itemsize, 8)
    c_pad = max(_round_up(c, 128), 128)               # lane padding in VMEM
    # bytes per tile row across live buffers:
    #   pred (double-buffered) + labels (lane-padded i32, double-buffered) + f32 acc scratch
    per_row = 2 * c_pad * itemsize + 2 * 128 * 4 + 128 * 4
    if requested is None:
        t = max(vmem_budget // per_row, align)
        t = min(t, 4096)                              # mem-bound: big tiles, bounded grid
    else:
        t = requested
    t = max(align, (t // align) * align)
    if t >= n:
        return n                                      # single full-extent block
    return t


def multi_margin_loss_pallas(pred, labels, *, tile_n=None, vmem_budget_bytes=24 << 20):
    """pred: (N, C) float, labels: (N,) int. Returns scalar float32."""
    n, c = pred.shape
    labels2d = labels.reshape(n, 1).astype(jnp.int32)
    itemsize = jnp.dtype(pred.dtype).itemsize

    tn = _choose_tile_n(n, c, itemsize, requested=tile_n, vmem_budget=vmem_budget_bytes)
    n_tiles = pl.cdiv(n, tn)

    # Megacore split: 2 parallel slices when there is enough work; serial-safe on 1-TC chips.
    n_slices = 2 if n_tiles >= 2 else 1
    tiles_per_slice = pl.cdiv(n_tiles, n_slices)
    need_mask = (n_slices * tiles_per_slice * tn) != n

    def _tile_idx(p, t):
        # clamp padded trailing tiles (their rows are masked out inside the kernel)
        return jnp.minimum(p * tiles_per_slice + t, n_tiles - 1)

    pred_spec = pl.BlockSpec((tn, c), lambda p, t: (_tile_idx(p, t), 0))
    label_spec = pl.BlockSpec((tn, 1), lambda p, t: (_tile_idx(p, t), 0))
    # one lane-dense (8,128) partial-sum block per parallel slice
    out_spec = pl.BlockSpec((8, 128), lambda p, t: (p, 0))

    # explicit VMEM sizing (lane-padded, double-buffered) instead of scoped defaults
    c_pad = max(_round_up(c, 128), 128)
    need_bytes = (2 * tn * c_pad * itemsize     # pred blocks
                  + 2 * tn * 128 * 4            # label blocks (lane-padded i32)
                  + tn * 128 * 4                # accumulator scratch
                  + 2 * 8 * 128 * 4)            # output block
    vmem_limit = int(min(100 << 20, max(16 << 20, need_bytes * 3 // 2 + (2 << 20))))

    kernel = functools.partial(
        _multi_margin_kernel,
        n_total=n,
        inv_nc=1.0 / float(n * c),
        need_mask=need_mask,
    )

    out = pl.pallas_call(
        kernel,
        out_shape=jax.ShapeDtypeStruct((n_slices * 8, 128), jnp.float32),
        grid_spec=pltpu.PrefetchScalarGridSpec(
            num_scalar_prefetch=0,
            grid=(n_slices, tiles_per_slice),
            in_specs=[pred_spec, label_spec],
            out_specs=out_spec,
            scratch_shapes=[pltpu.VMEM((tn, 1), jnp.float32)],
        ),
        compiler_params=pltpu.CompilerParams(
            dimension_semantics=("parallel", "arbitrary"),
            vmem_limit_bytes=vmem_limit,
        ),
    )(pred, labels2d)

    # add the per-slice partials (each (8,128) block holds a broadcast scalar)
    return jnp.sum(out.reshape(n_slices, 8, 128)[:, 0, 0])


def multi_margin_loss_ref(pred, labels):
    pred = pred.astype(jnp.float32)
    n, c = pred.shape
    onehot = jax.nn.one_hot(labels, c, dtype=jnp.bool_)
    x_y = jnp.sum(jnp.where(onehot, pred, 0.0), axis=1, keepdims=True)
    margins = jnp.maximum(0.0, 1.0 - x_y + pred)
    margins = jnp.where(onehot, 0.0, margins)
    return jnp.mean(jnp.sum(margins, axis=1) / c)


if __name__ == "__main__":
    key = jax.random.PRNGKey(0)
    k1, k2, k3, k4, k5, k6 = jax.random.split(key, 6)

    # 1) small CIFAR10-like logits: batch=8, classes=10 (single full-extent block)
    N, C = 8, 10
    pred = jax.random.normal(k1, (N, C), dtype=jnp.float32)
    labels = jax.random.randint(k2, (N,), 0, C, dtype=jnp.int32)
    loss = jax.block_until_ready(multi_margin_loss_pallas(pred, labels))
    ref = multi_margin_loss_ref(pred, labels)
    assert jnp.allclose(loss, ref, atol=1e-5, rtol=1e-5), (loss, ref)

    # 2) tiled path with remainder masking + 2-way parallel slices:
    #    N=200, tile_n=64 -> 4 tiles, 2 slices x 2 tiles, last tile 8/64 rows valid
    N2, C2 = 200, 10
    pred2 = jax.random.normal(k3, (N2, C2), dtype=jnp.float32)
    labels2 = jax.random.randint(k4, (N2,), 0, C2, dtype=jnp.int32)
    loss2 = jax.block_until_ready(multi_margin_loss_pallas(pred2, labels2, tile_n=64))
    ref2 = multi_margin_loss_ref(pred2, labels2)
    assert jnp.allclose(loss2, ref2, atol=1e-5, rtol=1e-5), (loss2, ref2)

    # 3) odd tile count -> one clamped/padded tile on slice 1 (exercises the clamp path)
    N3, C3 = 300, 10
    pred3 = jax.random.normal(k5, (N3, C3), dtype=jnp.float32)
    labels3 = jax.random.randint(k6, (N3,), 0, C3, dtype=jnp.int32)
    loss3 = jax.block_until_ready(multi_margin_loss_pallas(pred3, labels3, tile_n=64))
    ref3 = multi_margin_loss_ref(pred3, labels3)
    assert jnp.allclose(loss3, ref3, atol=1e-5, rtol=1e-5), (loss3, ref3)

    # 4) bf16 logits streamed natively (cast to f32 inside the kernel)
    pred4 = pred2.astype(jnp.bfloat16)
    loss4 = jax.block_until_ready(multi_margin_loss_pallas(pred4, labels2, tile_n=64))
    ref4 = multi_margin_loss_ref(pred4, labels2)
    assert jnp.allclose(loss4, ref4, atol=1e-2, rtol=1e-2), (loss4, ref4)

    # 5) default (auto) tile on a bigger batch, exercising the VMEM-aware default
    loss5 = jax.block_until_ready(multi_margin_loss_pallas(pred3, labels3))
    assert jnp.allclose(loss5, ref3, atol=1e-5, rtol=1e-5), (loss5, ref3)

    print("KERNEL_OK")
</pallas_src>

<mosaic_0001>
module attributes {stable_mosaic.version = 11 : i64} {
  func.func @_multi_margin_kernel(%arg0: i32, %arg1: i32, %arg2: memref<8x10xf32, #tpu.memory_space<vmem>>, %arg3: memref<8x1xi32, #tpu.memory_space<vmem>>, %arg4: memref<8x128xf32, #tpu.memory_space<vmem>>, %arg5: memref<8x1xf32, #tpu.memory_space<vmem>>) attributes {dimension_semantics = [#tpu.dimension_semantics<parallel>, #tpu.dimension_semantics<arbitrary>], iteration_bounds = array<i64: 1, 1>, scalar_prefetch = 0 : i64, scratch_operands = 1 : i64, tpu.core_type = #tpu.core_type<tc>, window_params = [{transform_indices = @transform_0, window_bounds = array<i64: 8, 10>}, {transform_indices = @transform_1, window_bounds = array<i64: 8, 1>}, {transform_indices = @transform_2, window_bounds = array<i64: 8, 128>}]} {
    %c0_i32 = arith.constant 0 : i32
    %0 = arith.cmpi eq, %arg1, %c0_i32 : i32
    %1 = arith.extui %0 : i1 to i32
    %c0_i32_0 = arith.constant 0 : i32
    %2 = arith.cmpi ne, %1, %c0_i32_0 : i32
    scf.if %2 {
      %cst_15 = arith.constant 0.000000e+00 : f32
      %28 = vector.broadcast %cst_15 : f32 to vector<8x1xf32>
      %c0_16 = arith.constant 0 : index
      %c0_17 = arith.constant 0 : index
      %29 = vector.load %arg5[%c0_16, %c0_17] : memref<8x1xf32, #tpu.memory_space<vmem>>, vector<8x1xf32>
      tpu.vector_store %arg5[%c0_16, %c0_17], %28 {strides = array<i32>} : memref<8x1xf32, #tpu.memory_space<vmem>>, vector<8x1xf32>,
    } else {
    }
    %c0 = arith.constant 0 : index
    %c0_1 = arith.constant 0 : index
    %3 = vector.load %arg2[%c0, %c0_1] : memref<8x10xf32, #tpu.memory_space<vmem>>, vector<8x10xf32>
    %c0_2 = arith.constant 0 : index
    %c0_3 = arith.constant 0 : index
    %4 = vector.load %arg3[%c0_2, %c0_3] : memref<8x1xi32, #tpu.memory_space<vmem>>, vector<8x1xi32>
    %5 = tpu.iota {dimensions = array<i32: 1>} : vector<8x10xi32>
    %6 = vector.broadcast %4 : vector<8x1xi32> to vector<8x10xi32>
    %7 = arith.cmpi eq, %5, %6 : vector<8x10xi32>
    %cst = arith.constant 0.000000e+00 : f32
    %8 = vector.broadcast %cst : f32 to vector<8x10xf32>
    %9 = arith.select %7, %3, %8 : vector<8x10xi1>, vector<8x10xf32>
    %cst_4 = arith.constant dense<0.000000e+00> : vector<8xf32>
    %10 = vector.multi_reduction <add>, %9, %cst_4 [1] : vector<8x10xf32> to vector<8xf32>
    %11 = vector.shape_cast %10 : vector<8xf32> to vector<8x1xf32>
    %cst_5 = arith.constant 1.000000e+00 : f32
    %12 = vector.broadcast %cst_5 : f32 to vector<8x1xf32>
    %13 = arith.subf %12, %11 : vector<8x1xf32>
    %14 = vector.broadcast %13 : vector<8x1xf32> to vector<8x10xf32>
    %15 = arith.addf %14, %3 : vector<8x10xf32>
    %cst_6 = arith.constant 0.000000e+00 : f32
    %16 = vector.broadcast %cst_6 : f32 to vector<8x10xf32>
    %17 = arith.maximumf %16, %15 : vector<8x10xf32>
    %cst_7 = arith.constant 0.000000e+00 : f32
    %18 = vector.broadcast %cst_7 : f32 to vector<8x10xf32>
    %19 = arith.select %7, %18, %17 : vector<8x10xi1>, vector<8x10xf32>
    %cst_8 = arith.constant dense<0.000000e+00> : vector<8xf32>
    %20 = vector.multi_reduction <add>, %19, %cst_8 [1] : vector<8x10xf32> to vector<8xf32>
    %21 = vector.shape_cast %20 : vector<8xf32> to vector<8x1xf32>
    %c0_9 = arith.constant 0 : index
    %c0_10 = arith.constant 0 : index
    %22 = vector.load %arg5[%c0_9, %c0_10] : memref<8x1xf32, #tpu.memory_space<vmem>>, vector<8x1xf32>
    %23 = arith.addf %22, %21 : vector<8x1xf32>
    %c0_11 = arith.constant 0 : index
    %c0_12 = arith.constant 0 : index
    %24 = vector.load %arg5[%c0_11, %c0_12] : memref<8x1xf32, #tpu.memory_space<vmem>>, vector<8x1xf32>
    tpu.vector_store %arg5[%c0_11, %c0_12], %23 {strides = array<i32>} : memref<8x1xf32, #tpu.memory_space<vmem>>, vector<8x1xf32>,
    %c0_i32_13 = arith.constant 0 : i32
    %25 = arith.cmpi eq, %arg1, %c0_i32_13 : i32
    %26 = arith.extui %25 : i1 to i32
    %c0_i32_14 = arith.constant 0 : i32
    %27 = arith.cmpi ne, %26, %c0_i32_14 : i32
    scf.if %27 {
      %c0_15 = arith.constant 0 : index
      %c0_16 = arith.constant 0 : index
      %28 = vector.load %arg5[%c0_15, %c0_16] : memref<8x1xf32, #tpu.memory_space<vmem>>, vector<8x1xf32>
      %cst_17 = arith.constant dense<0.000000e+00> : vector<1xf32>
      %29 = vector.multi_reduction <add>, %28, %cst_17 [0] : vector<8x1xf32> to vector<1xf32>
      %30 = vector.shape_cast %29 : vector<1xf32> to vector<1x1xf32>
      %cst_18 = arith.constant 1.250000e-02 : f32
      %31 = vector.broadcast %cst_18 : f32 to vector<1x1xf32>
      %32 = arith.mulf %30, %31 : vector<1x1xf32>
      %33 = vector.shape_cast %32 : vector<1x1xf32> to vector<1x1xf32>
      %34 = vector.broadcast %33 : vector<1x1xf32> to vector<8x128xf32>
      %c0_19 = arith.constant 0 : index
      %c0_20 = arith.constant 0 : index
      %35 = vector.load %arg4[%c0_19, %c0_20] : memref<8x128xf32, #tpu.memory_space<vmem>>, vector<8x128xf32>
      tpu.vector_store %arg4[%c0_19, %c0_20], %34 {strides = array<i32>} : memref<8x128xf32, #tpu.memory_space<vmem>>, vector<8x128xf32>,
    } else {
    }
    return
  }
  func.func @transform_0(%arg0: i32, %arg1: i32) -> (i32, i32) {
    %c1_i32 = arith.constant 1 : i32
    %0 = arith.muli %arg0, %c1_i32 : i32
    %1 = arith.addi %0, %arg1 : i32
    %c0_i32 = arith.constant 0 : i32
    %2 = arith.minsi %1, %c0_i32 : i32
    %c0_i32_0 = arith.constant 0 : i32
    %c0_i32_1 = arith.constant 0 : i32
    return %2, %c0_i32_0 : i32, i32
  }
  func.func @transform_1(%arg0: i32, %arg1: i32) -> (i32, i32) {
    %c1_i32 = arith.constant 1 : i32
    %0 = arith.muli %arg0, %c1_i32 : i32
    %1 = arith.addi %0, %arg1 : i32
    %c0_i32 = arith.constant 0 : i32
    %2 = arith.minsi %1, %c0_i32 : i32
    %c0_i32_0 = arith.constant 0 : i32
    %c0_i32_1 = arith.constant 0 : i32
    return %2, %c0_i32_0 : i32, i32
  }
  func.func @transform_2(%arg0: i32, %arg1: i32) -> (i32, i32) {
    %c0_i32 = arith.constant 0 : i32
    %c0_i32_0 = arith.constant 0 : i32
    return %arg0, %c0_i32 : i32, i32
  }
}

</mosaic_0001>

<bundles_post_ra>
// kernel: tpu_custom_call.1
= control target key start
LH: loop header
LB: loop body
LE: loop exit
PB: predicated region body
PF: predicated region fallthrough
CT: control target
= control target key end

     0   :  { %s205_s0 = inlined_call_operand.vmem [shape: f32[8,10], index: 0, kind: input, shape index: {}]   ;;  %s206_s1 = inlined_call_operand.vmem [shape: s32[8,1], index: 1, kind: input, shape index: {}]   ;;  %s207_s2 = inlined_call_operand.hbm [shape: f32[8,128], index: 2, kind: output, shape index: {}]  }
   0x1   :  { %v73_v0 = vld [vmem:[%s206_s1] sm:$0xff] }
   0x2   :  { %7 = vsyncpa [#allocation4], 0  ;;  %v169_v1 = vmov 0   ;;  %v74_v2 = vlaneseq  ;;  %v72_v4 = vld [vmem:[%s205_s0] sm:$0xff]  ;;  %vm81_vm0 = vcmask 80896   ;;  %vm70_vm2 = vcmask 7168  }
   0x3   :  { %143 = vset.pattern.permute.xlu0 %v169_v1  ;;  %144 = vset.pattern.permute.xlu1 %v169_v1  ;;  %v170_v14 = vmov 0.0   ;;  %s171_s0 = smov [#allocation3]  }
   0x4   :  { %77 = vperm.xlu0 %143, %v73_v0   ;;  %v75_v3 = vand.u32 127, %v74_v2  ;;  %71 = vst.msk [vmem:[#allocation2] sm:$0xff] %vm70_vm2, %v170_v14  ;;  %s120_s1 = sshll.u32 %s171_s0, 4  ;;  %s121_s1 = int_to_ptr.vmem [resolvable:$true] %s120_s1 }
   0x5   :  { %s145_s13 = scalar_lea.vmem %s121_s1, 128  ;;  %p150_p1 = scmp.lt.s32.totalorder %s121_s1, %s121_s1 }
   0x6   :  { %p146_p0 = scmp.ne.s32.totalorder %s121_s1, %s145_s13  ;;  %p151_p2 = scmp.lt.s32.totalorder %s145_s13, %s145_s13 }
   0x8   :  { %p152_p3 = por %p151_p2, %p150_p1 }
   0xa   :  { %p153_p4 = pnand %p152_p3, %p146_p0 }
   0xb   :  { %v92_v15 = vld [vmem:[#allocation2] sm:$0xff] }
  0x83   :  { %v78_v5 = vpop.permute.xlu0 %77 }
  0x84   :  { %vm79_vm1 = vcmp.eq.s32.totalorder %v75_v3, %v78_v5 }
  0x85   :  { %v80_v6 = vsel %vm79_vm1, %v72_v4, 0.0 }
  0x86   :  { %v82_v7 = vsel %vm81_vm0, %v80_v6, 0.0 }
  0x87   :  { %83 = vadd.xlane.f32.xlu0 %v82_v7 }
 0x114   :  { %v84_v8 = vpop.xlane.xlu0 %83 }
 0x115   :  { %v85_v9 = vsub.f32 1.0, %v84_v8 }
 0x117   :  { %v86_v10 = vadd.f32 %v85_v9, %v72_v4 }
 0x119   :  { %v87_v11 = vmax.f32 %v86_v10, 0.0 }
 0x11b   :  { %v88_v12 = vsel %vm79_vm1, 0.0, %v87_v11 }
 0x11c   :  { %v89_v13 = vsel %vm81_vm0, %v88_v12, 0.0 }
 0x11d   :  { %90 = vadd.xlane.f32.xlu1 %v89_v13 }
 0x1aa   :  { %v91_v16 = vpop.xlane.xlu1 %90 }
 0x1ab   :  { %v93_v17 = vadd.f32 %v92_v15, %v91_v16 }
 0x1ad   :  { %95 = vst.msk [vmem:[#allocation2] sm:$0xff] %vm70_vm2, %v93_v17 }
 0x1b4   :  { %v99_v18 = vld [vmem:[#allocation2] sm:$0xff] }
 0x1b5   :  { %v100_v19 = vsel %vm70_vm2, %v99_v18, 0.0 }
 0x1b6   :  { %v101_v20 = vrot.slane %v100_v19, 4 }
 0x1b8   :  { %v102_v21 = vadd.f32 %v101_v20, %v100_v19 }
 0x1ba   :  { %v103_v22 = vrot.slane %v102_v21, 2 }
 0x1bc   :  { %v104_v23 = vadd.f32 %v103_v22, %v102_v21 }
 0x1be   :  { %v105_v24 = vrot.slane %v104_v23, 1 }
 0x1c0   :  { %v106_v25 = vadd.f32 %v105_v24, %v104_v23 }
 0x1c2   :  { %v107_v26 = vmul.f32 0.0125, %v106_v25 }
 0x1c4   :  { %110 = vperm.xlu1 %144, %v107_v26  }
 0x243   :  { %v111_v27 = vpop.permute.xlu1 %110 }
 0x244   :  { %113 = vst [vmem:[#allocation3] sm:$0xff] %v111_v27 }
 0x245   :  { %156 = shalt.err (!%p153_p4)
}
 0x246   :  { %s157_s16 = scalar_lea.hbm %s207_s2, 128 }
 0x247   :  { %p158_p5 = scmp.ne.s32.totalorder %s207_s2, %s157_s16  ;;  %p161_p6 = scmp.lt.u32.totalorder %s157_s16, %s207_s2 }
 0x249   :  { %p163_p7 = pnand %p161_p6, %p158_p5 }
 0x24b   :  { %166 = shalt.err (!%p163_p7)
}
 0x24c   :  { %123 = dma.vmem_to_hbm [thread:$0]  %s121_s1, 128, %s207_s2, [#allocation4]  }
 0x24d   :  { %167 = dma.done.wait [#allocation4], 128  }
 0x24e   :  { %168 = vsyncadd [#allocation4], 4294967168 }
 0x24f   :  { %127 = vsyncpa [#allocation4], 1 }

</bundles_post_ra>
